<compile_context>
chip_gen: v6e
topology: v6e:2x2x1
jax: 0.10.0
libtpu: 0.0.40
codegen_flags: <defaults>
</compile_context>

<pallas_src>
import functools

import jax
import jax.numpy as jnp
from jax.experimental import pallas as pl
from jax.experimental.pallas import tpu as pltpu


def _focal_loss_kernel(x_ref, t_ref, o_ref, *, gamma, alpha, n_class):
    """One (batch, pixel-tile) grid step.

    x_ref: (1, C, TS, 128)  logits for this image / pixel tile
    t_ref: (1, TS, 128)     int32 labels (-1 marks padded pixels)
    o_ref: (1, 1, 8, 128)   float32 partial loss sums for this tile
    """
    x = x_ref[0].astype(jnp.float32)           # (C, TS, 128)
    t = t_ref[0]                               # (TS, 128)

    # numerically stable softmax pieces over the class axis
    m = jnp.max(x, axis=0)                     # (TS, 128)
    e = jnp.exp(x - m[None, :, :])             # (C, TS, 128)   C exps / pixel
    denom = jnp.sum(e, axis=0)                 # (TS, 128)

    # Gather the target-class softmax numerator and alpha via compares.
    # Pixels whose label is outside [0, n_class) (incl. the -1 padding) keep
    # a_t == 0 and therefore contribute exactly 0, matching the one-hot ref.
    e_t = jnp.zeros_like(m)
    a_t = jnp.zeros_like(m)
    for i in range(n_class):
        hit = t == i
        e_t = jnp.where(hit, e[i], e_t)
        a_t = jnp.where(hit, jnp.float32(alpha[i]), a_t)

    pt_t = jnp.clip(e_t / denom, 1e-6, 0.999999)   # clip only the gathered prob
    focal = (1.0 - pt_t) ** gamma                  # gamma is a Python int
    loss = -a_t * focal * jnp.log(pt_t)            # one log per pixel

    # sublane-group reduce (TS,128) -> (8,128): VPU adds only, lane-dense store
    ts = loss.shape[0]
    o_ref[0, 0] = jnp.sum(loss.reshape(ts // 8, 8, 128), axis=0)


def focal_loss(logits, target, *, gamma=2, alpha=(0.5, 0.5), n_class=2,
               reduction="mean", tile_sublanes=512):
    """FocalLoss forward.  logits: (N, C, H, W) float; target: (N, H, W) int."""
    if len(alpha) < n_class:
        raise ValueError("len(alpha) must be >= n_class")
    N, C, H, W = logits.shape
    P = H * W

    # Put pixels on both sublane and lane axes: (N, C, rows, 128).
    rows = -(-P // 128)
    ts = int(tile_sublanes)
    if rows <= ts:
        ts = max(8, -(-rows // 8) * 8)
    rows_padded = -(-rows // ts) * ts
    n_tiles = rows_padded // ts
    p_padded = rows_padded * 128

    x = logits.reshape(N, C, P)
    # TODO(synk): int8 labels / bf16 logits would further cut HBM bytes on v5e.
    t = target.astype(jnp.int32).reshape(N, P)
    if p_padded != P:
        x = jnp.pad(x, ((0, 0), (0, 0), (0, p_padded - P)))
        t = jnp.pad(t, ((0, 0), (0, p_padded - P)), constant_values=-1)
    x = x.reshape(N, C, rows_padded, 128)
    t = t.reshape(N, rows_padded, 128)

    kernel = functools.partial(
        _focal_loss_kernel, gamma=gamma,
        alpha=tuple(float(a) for a in alpha), n_class=n_class)

    partials = pl.pallas_call(
        kernel,
        out_shape=jax.ShapeDtypeStruct((N, n_tiles, 8, 128), jnp.float32),
        grid=(N, n_tiles),
        in_specs=[
            pl.BlockSpec((1, C, ts, 128), lambda n, p: (n, 0, p, 0)),
            pl.BlockSpec((1, ts, 128), lambda n, p: (n, p, 0)),
        ],
        out_specs=pl.BlockSpec((1, 1, 8, 128), lambda n, p: (n, p, 0, 0)),
        compiler_params=pltpu.CompilerParams(
            dimension_semantics=("parallel", "parallel")),
    )(x, t)

    total = jnp.sum(partials, dtype=jnp.float32)
    if reduction == "mean":
        return total / jnp.float32(N * H * W)
    if reduction == "sum":
        return total
    # TODO(synk): reduction='none' needs the per-pixel loss map as kernel output.
    raise NotImplementedError(f"unsupported reduction: {reduction}")


def _focal_loss_ref(logits, target, gamma=2, alpha=(0.5, 0.5), n_class=2,
                    reduction="mean"):
    pt = jax.nn.softmax(logits.astype(jnp.float32), axis=1)
    pt = jnp.clip(pt, 1e-6, 0.999999)
    loss = jnp.zeros(target.shape, jnp.float32)
    for i in range(n_class):
        onehot = (target == i).astype(jnp.float32)
        loss = loss - alpha[i] * (1.0 - pt[:, i]) ** gamma * onehot * jnp.log(pt[:, i])
    return jnp.mean(loss) if reduction == "mean" else jnp.sum(loss)


if __name__ == "__main__":
    key = jax.random.PRNGKey(0)
    k1, k2, k3, k4 = jax.random.split(key, 4)

    # binary foreground/background case (module defaults), mean reduction
    N, C, H, W = 2, 2, 16, 16
    logits = jax.random.normal(k1, (N, C, H, W), dtype=jnp.float32)
    target = jax.random.randint(k2, (N, H, W), 0, C, dtype=jnp.int32)
    out = jax.block_until_ready(
        focal_loss(logits, target, gamma=2, alpha=(0.5, 0.5), n_class=C,
                   reduction="mean"))
    ref = _focal_loss_ref(logits, target, gamma=2, alpha=(0.5, 0.5), n_class=C)
    assert jnp.allclose(out, ref, rtol=1e-5, atol=1e-6), (out, ref)

    # multi-class, non-128-aligned spatial size (exercises padding), sum reduction
    N2, C2, H2, W2 = 2, 3, 13, 9
    logits2 = jax.random.normal(k3, (N2, C2, H2, W2), dtype=jnp.float32)
    target2 = jax.random.randint(k4, (N2, H2, W2), 0, C2, dtype=jnp.int32)
    alpha2 = (0.25, 0.5, 0.25)
    out2 = jax.block_until_ready(
        focal_loss(logits2, target2, gamma=2, alpha=alpha2, n_class=C2,
                   reduction="sum"))
    ref2 = _focal_loss_ref(logits2, target2, gamma=2, alpha=alpha2,
                           n_class=C2, reduction="sum")
    assert jnp.allclose(out2, ref2, rtol=1e-5, atol=1e-5), (out2, ref2)

    print("KERNEL_OK")
</pallas_src>

<mosaic_0001>
module attributes {stable_mosaic.version = 11 : i64} {
  func.func @_focal_loss_kernel(%arg0: i32, %arg1: i32, %arg2: memref<1x2x8x128xf32, #tpu.memory_space<vmem>>, %arg3: memref<1x8x128xi32, #tpu.memory_space<vmem>>, %arg4: memref<1x1x8x128xf32, #tpu.memory_space<vmem>>) attributes {dimension_semantics = [#tpu.dimension_semantics<parallel>, #tpu.dimension_semantics<parallel>], iteration_bounds = array<i64: 2, 1>, scalar_prefetch = 0 : i64, scratch_operands = 0 : i64, tpu.core_type = #tpu.core_type<tc>, window_params = [{transform_indices = @transform_0, window_bounds = array<i64: 1, 2, 8, 128>}, {transform_indices = @transform_1, window_bounds = array<i64: 1, 8, 128>}, {transform_indices = @transform_2, window_bounds = array<i64: 1, 1, 8, 128>}]} {
    %c0 = arith.constant 0 : index
    %c0_0 = arith.constant 0 : index
    %c0_1 = arith.constant 0 : index
    %c0_2 = arith.constant 0 : index
    %0 = vector.load %arg2[%c0, %c0_0, %c0_1, %c0_2] : memref<1x2x8x128xf32, #tpu.memory_space<vmem>>, vector<1x2x8x128xf32>
    %1 = vector.shape_cast %0 : vector<1x2x8x128xf32> to vector<2x8x128xf32>
    %c0_3 = arith.constant 0 : index
    %c0_4 = arith.constant 0 : index
    %c0_5 = arith.constant 0 : index
    %2 = vector.load %arg3[%c0_3, %c0_4, %c0_5] : memref<1x8x128xi32, #tpu.memory_space<vmem>>, vector<1x8x128xi32>
    %3 = vector.shape_cast %2 : vector<1x8x128xi32> to vector<8x128xi32>
    %cst = arith.constant dense<0xFF800000> : vector<8x128xf32>
    %4 = vector.multi_reduction <maximumf>, %1, %cst [0] : vector<2x8x128xf32> to vector<8x128xf32>
    %5 = vector.shape_cast %4 : vector<8x128xf32> to vector<1x8x128xf32>
    %6 = vector.broadcast %5 : vector<1x8x128xf32> to vector<2x8x128xf32>
    %7 = arith.subf %1, %6 : vector<2x8x128xf32>
    %8 = math.exp %7 : vector<2x8x128xf32>
    %cst_6 = arith.constant dense<0.000000e+00> : vector<8x128xf32>
    %9 = vector.multi_reduction <add>, %8, %cst_6 [0] : vector<2x8x128xf32> to vector<8x128xf32>
    %cst_7 = arith.constant 0.000000e+00 : f32
    %10 = vector.broadcast %cst_7 : f32 to vector<8x128xf32>
    %cst_8 = arith.constant 0.000000e+00 : f32
    %11 = vector.broadcast %cst_8 : f32 to vector<8x128xf32>
    %c0_i32 = arith.constant 0 : i32
    %12 = vector.broadcast %c0_i32 : i32 to vector<8x128xi32>
    %13 = arith.cmpi eq, %3, %12 : vector<8x128xi32>
    %14 = vector.extract_strided_slice %8 {offsets = [0, 0, 0], sizes = [1, 8, 128], strides = [1, 1, 1]} : vector<2x8x128xf32> to vector<1x8x128xf32>
    %15 = vector.shape_cast %14 : vector<1x8x128xf32> to vector<8x128xf32>
    %16 = arith.select %13, %15, %10 : vector<8x128xi1>, vector<8x128xf32>
    %cst_9 = arith.constant 5.000000e-01 : f32
    %17 = vector.broadcast %cst_9 : f32 to vector<8x128xf32>
    %18 = arith.select %13, %17, %11 : vector<8x128xi1>, vector<8x128xf32>
    %c1_i32 = arith.constant 1 : i32
    %19 = vector.broadcast %c1_i32 : i32 to vector<8x128xi32>
    %20 = arith.cmpi eq, %3, %19 : vector<8x128xi32>
    %21 = vector.extract_strided_slice %8 {offsets = [1, 0, 0], sizes = [1, 8, 128], strides = [1, 1, 1]} : vector<2x8x128xf32> to vector<1x8x128xf32>
    %22 = vector.shape_cast %21 : vector<1x8x128xf32> to vector<8x128xf32>
    %23 = arith.select %20, %22, %16 : vector<8x128xi1>, vector<8x128xf32>
    %cst_10 = arith.constant 5.000000e-01 : f32
    %24 = vector.broadcast %cst_10 : f32 to vector<8x128xf32>
    %25 = arith.select %20, %24, %18 : vector<8x128xi1>, vector<8x128xf32>
    %26 = arith.divf %23, %9 : vector<8x128xf32>
    %cst_11 = arith.constant 9.99999997E-7 : f32
    %cst_12 = arith.constant 0.999998986 : f32
    %27 = vector.broadcast %cst_11 : f32 to vector<8x128xf32>
    %28 = arith.maximumf %27, %26 : vector<8x128xf32>
    %29 = vector.broadcast %cst_12 : f32 to vector<8x128xf32>
    %30 = arith.minimumf %29, %28 : vector<8x128xf32>
    %cst_13 = arith.constant 1.000000e+00 : f32
    %31 = vector.broadcast %cst_13 : f32 to vector<8x128xf32>
    %32 = arith.subf %31, %30 : vector<8x128xf32>
    %33 = arith.mulf %32, %32 : vector<8x128xf32>
    %cst_14 = arith.constant 0.000000e+00 : f32
    %34 = vector.broadcast %cst_14 : f32 to vector<8x128xf32>
    %35 = arith.subf %34, %25 : vector<8x128xf32>
    %36 = arith.mulf %35, %33 : vector<8x128xf32>
    %37 = math.log %30 : vector<8x128xf32>
    %38 = arith.mulf %36, %37 : vector<8x128xf32>
    %39 = vector.shape_cast %38 : vector<8x128xf32> to vector<1x8x128xf32>
    %cst_15 = arith.constant dense<0.000000e+00> : vector<8x128xf32>
    %40 = vector.multi_reduction <add>, %39, %cst_15 [0] : vector<1x8x128xf32> to vector<8x128xf32>
    %c0_16 = arith.constant 0 : index
    %c0_17 = arith.constant 0 : index
    %c0_18 = arith.constant 0 : index
    %c0_19 = arith.constant 0 : index
    %41 = vector.load %arg4[%c0_16, %c0_17, %c0_18, %c0_19] : memref<1x1x8x128xf32, #tpu.memory_space<vmem>>, vector<1x1x8x128xf32>
    %42 = vector.shape_cast %41 : vector<1x1x8x128xf32> to vector<8x128xf32>
    %43 = vector.shape_cast %40 : vector<8x128xf32> to vector<1x1x8x128xf32>
    tpu.vector_store %arg4[%c0_16, %c0_17, %c0_18, %c0_19], %43 {strides = array<i32>} : memref<1x1x8x128xf32, #tpu.memory_space<vmem>>, vector<1x1x8x128xf32>,
    return
  }
  func.func @transform_0(%arg0: i32, %arg1: i32) -> (i32, i32, i32, i32) {
    %c0_i32 = arith.constant 0 : i32
    %c0_i32_0 = arith.constant 0 : i32
    %c0_i32_1 = arith.constant 0 : i32
    return %arg0, %c0_i32, %arg1, %c0_i32_0 : i32, i32, i32, i32
  }
  func.func @transform_1(%arg0: i32, %arg1: i32) -> (i32, i32, i32) {
    %c0_i32 = arith.constant 0 : i32
    %c0_i32_0 = arith.constant 0 : i32
    return %arg0, %arg1, %c0_i32 : i32, i32, i32
  }
  func.func @transform_2(%arg0: i32, %arg1: i32) -> (i32, i32, i32, i32) {
    %c0_i32 = arith.constant 0 : i32
    %c0_i32_0 = arith.constant 0 : i32
    %c0_i32_1 = arith.constant 0 : i32
    return %arg0, %arg1, %c0_i32, %c0_i32_0 : i32, i32, i32, i32
  }
}

</mosaic_0001>

<bundles_post_ra>
// kernel: tpu_custom_call.1
= control target key start
LH: loop header
LB: loop body
LE: loop exit
PB: predicated region body
PF: predicated region fallthrough
CT: control target
= control target key end

     0   :  { %7 = vsyncpa [#allocation3], 0  ;;  %s794_s0 = inlined_call_operand.hbm [shape: f32[2,2,8,128], index: 0, kind: input, shape index: {}]   ;;  %s795_s1 = inlined_call_operand.hbm [shape: s32[2,8,128], index: 1, kind: input, shape index: {}]   ;;  %s796_s2 = inlined_call_operand.hbm [shape: f32[2,1,8,128], index: 2, kind: output, shape index: {}]  }
   0x1   :  { %9 = vsyncpa [#allocation3 + $0x1], 0 }
   0x2   :  { %10 = vsyncpa [#allocation6], 0 }
   0x3   :  { %12 = vsyncpa [#allocation6 + $0x1], 0 }
   0x4   :  { %13 = vsyncpa [#allocation4], 0 }
   0x5   :  { %15 = vsyncpa [#allocation4 + $0x1], 0  ;;  %s628_s9 = smov 0   ;;  %s630_s10 = smov 0  }
   0x6   :  { %s632_s11 = smov 0   ;;  %s634_s12 = smov 0  }
   0x7   :  { %s636_s13 = smov 0   ;;  %s638_s14 = smov 0  }
   0x8 LB: > { %s369_s15 = sadd.s32 4294967295, %s605_s14   ;;  %s370_s16 = sadd.s32 4294967294, %s605_s14   ;;  %s605_s14 = sphi %s638_s14, %s21_s14   ;;  %s601_s13 = sphi %s636_s13, %s808_s13   ;;  %s597_s12 = sphi %s634_s12, %s807_s12   ;;  %s593_s11 = sphi %s632_s11, %s806_s11   ;;  %s589_s10 = sphi %s630_s10, %s805_s10   ;;  %s585_s9 = sphi %s628_s9, %s804_s9  }
   0x9   : > { %s33_s17 = sadd.s32 1, %s601_s13  ;;  %s42_s18 = sadd.s32 1, %s593_s11 }
   0xa   : > { %p35_p0 = scmp.ge.s32.totalorder %s33_s17, 2  ;;  %p49_p1 = scmp.ne.s32.totalorder %s593_s11, %s589_s10 }
   0xb   : > { %p50_p2 = scmp.eq.s32.totalorder %s605_s14, 0  ;;  %p55_p3 = scmp.ne.s32.totalorder %s589_s10, %s585_s9 }
   0xc   : > { %s810_s17 = smov (%p35_p0, %s33_s17), 0  ;;  %p56_p5 = scmp.eq.s32.totalorder %s369_s15, 0 }
   0xd   : > { %p669_p4 = por %p50_p2, %p49_p1  ;;  %s37_s20 = ssub.s32 %s601_s13, %s810_s17 }
   0xe   : > { %p109_p6 = scmp.eq.s32.totalorder %s369_s15, 1  ;;  %p40_p7 = scmp.eq.s32.totalorder %s37_s20, 0 }
   0xf   : > { %p675_p8 = por %p56_p5, %p55_p3  ;;  %p115_p10 = scmp.eq.s32.totalorder %s370_s16, 1 }
  0x10   : > { %p679_p9 = por %p109_p6, %p49_p1  ;;  %p404_p13 = scmp.lt.s32.totalorder %s605_s14, 2 }
  0x11   : > { %s684_s23 = scalar_select %p40_p7, %s593_s11, %s42_s18  }
  0x12   : > { %p686_p11 = por %p115_p10, %p55_p3  ;;  %s693_s25 = sand.u32 1, %s593_s11  }
  0x13   : > { %s373_s26 = sshll.u32 %s693_s25, 4  ;;  %s386_s27 = sshll.u32 %s601_s13, 8 }
  0x14   : > { %s146_s30 = scalar_lea.hbm %s794_s0, %s386_s27  ;;  %s139_s3 = scalar_lea.vmem [#allocation2], %s373_s26 }
  0x15   : > { %s147_s4 = sshll.u32 %s139_s3, 4  ;;  %p702_p0 = pnand %p404_p13, %p669_p4  ;;  %s148_s4 = int_to_ptr.vmem [resolvable:$true] %s147_s4 }
  0x16   : > { %p378_p1 = scmp.ge.s32.totalorder %s605_s14, 1  ;;  %s136_s6 = scalar_lea.sflag [#allocation3], %s693_s25 }
  0x17   : > { %p467_p2 = pneg %p702_p0  ;;  %s478_s7 = scalar_lea.vmem %s148_s4, 256 }
  0x18   : > { %p479_p3 = scmp.ne.s32.totalorder %s148_s4, %s478_s7  ;;  %s607_s8 = smov [#allocation2]  }
  0x19   : > { %s483_s15 = sshll.u32 %s607_s8, 4  ;;  %s484_s15 = int_to_ptr.vmem [resolvable:$false] %s483_s15 }
  0x1a   : > { %p481_p5 = pnand %p479_p3, %p467_p2  ;;  %s485_s16 = scalar_lea.vmem %s484_s15, 512 }
  0x1b   : > { %p486_p4 = scmp.lt.s32.totalorder %s148_s4, %s484_s15  ;;  %p487_p7 = scmp.lt.s32.totalorder %s485_s16, %s478_s7 }
  0x1c   : > { %p482_p6 = pneg %p481_p5 }
  0x1d   : > { %p488_p10 = por %p487_p7, %p486_p4 }
  0x1f   : > { %p489_p13 = pnand %p488_p10, %p482_p6 }
  0x21   : > { %492 = shalt.err (!%p489_p13)
}
  0x22   : > { %s608_s18 = smov 128   ;;  %s609_s19 = smov 8  }
  0x23   : > { %396 = dma.hbm_to_vmem [thread:$0]  (!%p702_p0), %s146_s30, 256, %s148_s4, %s136_s6, %s608_s18, %s608_s18, %s609_s19  }
  0x24   : > { %p174_p3 = scmp.lt.s32.totalorder %s605_s14, 3  ;;  %s376_s20 = sshll.u32 %s693_s25, 3 }
  0x25   : > { %s377_s26 = sshll.u32 %s601_s13, 7  ;;  %s161_s7 = scalar_lea.vmem [#allocation5], %s376_s20 }
  0x26   : > { %p720_p5 = pnand %p378_p1, %p174_p3  ;;  %s167_s3 = scalar_lea.hbm %s795_s1, %s377_s26 }
  0x27   : > { %s169_s8 = sshll.u32 %s161_s7, 4  ;;  %s158_s15 = scalar_lea.sflag [#allocation6], %s693_s25  ;;  %s170_s8 = int_to_ptr.vmem [resolvable:$true] %s169_s8 }
  0x28   : > { %s506_s16 = scalar_lea.vmem %s170_s8, 128  ;;  %s610_s30 = smov [#allocation5]  }
  0x29   : > { %p507_p6 = scmp.ne.s32.totalorder %s170_s8, %s506_s16  ;;  %s511_s4 = sshll.u32 %s610_s30, 4  ;;  %s512_s4 = int_to_ptr.vmem [resolvable:$false] %s511_s4 }
  0x2a   : > { %s513_s6 = scalar_lea.vmem %s512_s4, 256  ;;  %p514_p1 = scmp.lt.s32.totalorder %s170_s8, %s512_s4 }
  0x2b   : > { %p509_p4 = pnand %p507_p6, %p467_p2  ;;  %p515_p10 = scmp.lt.s32.totalorder %s513_s6, %s506_s16 }
  0x2d   : > { %p510_p7 = pneg %p509_p4  ;;  %p516_p13 = por %p515_p10, %p514_p1 }
  0x2f   : > { %p517_p3 = pnand %p516_p13, %p510_p7 }
  0x31   : > { %520 = shalt.err (!%p517_p3)
}
  0x32   : > { %399 = dma.hbm_to_vmem [thread:$0]  (!%p702_p0), %s167_s3, 128, %s170_s8, %s158_s15  }
  0x33   : > { %178 = sbr.rel (%p720_p5) target bundleno = 135 (0x87), region = 28  ;;  %s736_s25 = sand.u32 (!%p720_p5), 1, %s589_s10  }
  0x34   : > { %s379_s18 = sshll.u32 (!%p720_p5), %s736_s25, 4  ;;  %s181_s19 = scalar_lea.sflag (!%p720_p5), [#allocation3], %s736_s25 }
  0x35   : > { %s184_s20 = scalar_lea.vmem (!%p720_p5), [#allocation2], %s379_s18 }
  0x38   : > { %572 = dma.done.wait (%p675_p8), %s181_s19, 256  }
  0x39   : > { %574 = vsyncadd (%p675_p8), %s181_s19, 4294967040  ;;  %s380_s5 = sshll.u32 %s736_s25, 3  ;;  %s190_s26 = scalar_lea.sflag [#allocation6], %s736_s25 }
  0x3a   : > { %s193_s27 = scalar_lea.vmem [#allocation5], %s380_s5 }
  0x3b   : > { %576 = dma.done.wait (%p675_p8), %s190_s26, 128  }
  0x3c   : > { %578 = vsyncadd (%p675_p8), %s190_s26, 4294967168  ;;  %v219_v0 = vld [vmem:[%s184_s20] sm:$0xff]  ;;  %v220_v1 = vld [vmem:[%s184_s20 + $0x8] sm:$0xff]  ;;  %v611_v17 = vmov 0.0   ;;  %s218_s21 = scalar_lea.vmem [#allocation7], %s380_s5  ;;  %s383_s29 = sshll.u32 %s597_s12, 7 }
  0x3d   : > { %v222_v2 = vmax.f32 %v219_v0, %v220_v1  ;;  %v221_v10 = vld [vmem:[%s193_s27] sm:$0xff]  ;;  %s264_s28 = sshll.u32 %s218_s21, 4  ;;  %s262_s8 = scalar_lea.hbm %s796_s2, %s383_s29  ;;  %s265_s28 = int_to_ptr.vmem [resolvable:$true] %s264_s28 }
  0x3e   : > { %vm230_vm0 = vcmp.eq.s32.totalorder %v221_v10, 0  ;;  %vm233_vm1 = vcmp.eq.s32.totalorder %v221_v10, 1  ;;  %s250_s15 = scalar_lea.sflag [#allocation4], %s736_s25  ;;  %s521_s16 = scalar_lea.vmem %s265_s28, 128 }
  0x3f   : > { %v223_v3 = vsub.f32 %v219_v0, %v222_v2  ;;  %v224_v4 = vsub.f32 %v220_v1, %v222_v2  ;;  %v232_v18 = vsel %vm230_vm0, 0.5, %v611_v17  ;;  %p522_p8 = scmp.ne.s32.totalorder %s265_s28, %s521_s16  ;;  %s612_s30 = smov [#allocation7]  }
  0x40   : > { %v235_v20 = vsel %vm233_vm1, 0.5, %v232_v18  ;;  %s525_s4 = sshll.u32 %s612_s30, 4  ;;  %s526_s4 = int_to_ptr.vmem [resolvable:$false] %s525_s4 }
  0x41   : > { %v225_v5 = vmul.f32 1.442695, %v223_v3  ;;  %v227_v6 = vmul.f32 1.442695, %v224_v4  ;;  %v242_v22 = vsub.f32 0.0, %v235_v20  ;;  %p523_p0 = pnand %p522_p8, %p679_p9  ;;  %s527_s6 = scalar_lea.vmem %s526_s4, 256 }
  0x42   : > { %p528_p5 = scmp.lt.s32.totalorder %s265_s28, %s526_s4  ;;  %p529_p6 = scmp.lt.s32.totalorder %s527_s6, %s521_s16 }
  0x43   : > { %457 = vpow2.f32 %v225_v5  ;;  %p524_p2 = pneg %p523_p0 }
  0x44   : > { %459 = vpow2.f32 %v227_v6  ;;  %p530_p4 = por %p529_p6, %p528_p5 }
  0x46   : > { %p531_p7 = pnand %p530_p4, %p524_p2 }
  0x50   : > { %v458_v7 = vpop.eup %457 }
  0x51   : > { %v460_v8 = vpop.eup %459  ;;  %v231_v11 = vsel %vm230_vm0, %v458_v7, 0.0 }
  0x52   : > { %v229_v9 = vadd.f32 %v460_v8, %v458_v7  ;;  %v234_v12 = vsel %vm233_vm1, %v460_v8, %v231_v11 }
  0x54   : > { %461 = vrcp.f32 %v229_v9 }
  0x61   : > { %v462_v13 = vpop.eup %461 }
  0x62   : > { %v237_v14 = vmul.f32 %v462_v13, %v234_v12 }
  0x64   : > { %v238_v15 = vmax.f32 %v237_v14, 1e-06 }
  0x66   : > { %v239_v16 = vmin.f32 %v238_v15, 0.999999 }
  0x68   : > { %463 = vlog2.f32 %v239_v16  ;;  %v240_v19 = vsub.f32 1.0, %v239_v16 }
  0x6a   : > { %v241_v21 = vmul.f32 %v240_v19, %v240_v19 }
  0x6c   : > { %v243_v23 = vmul.f32 %v242_v22, %v241_v21 }
  0x75   : > { %v464_v24 = vpop.eup %463 }
  0x76   : > { %v245_v25 = vmul.f32 0.6931472, %v464_v24 }
  0x78   : > { %v246_v26 = vmul.f32 %v245_v25, %v243_v23 }
  0x7a   : > { %248 = vst [vmem:[%s218_s21] sm:$0xff] %v246_v26 }
  0x7b   : > { %534 = shalt.err (!%p531_p7)
}
  0x7c   : > { %s535_s12 = scalar_lea.hbm %s262_s8, 128  ;;  %s539_s19 = scalar_lea.hbm %s796_s2, 256 }
  0x7d   : > { %p536_p1 = scmp.ne.s32.totalorder %s262_s8, %s535_s12  ;;  %p540_p3 = scmp.lt.s32.totalorder %s262_s8, %s796_s2 }
  0x7e   : > { %p541_p8 = scmp.lt.s32.totalorder %s539_s19, %s535_s12 }
  0x7f   : > { %p537_p10 = pnand %p536_p1, %p679_p9 }
  0x80   : > { %p542_p0 = por %p541_p8, %p540_p3 }
  0x81   : > { %p538_p13 = pneg %p537_p10 }
  0x83   : > { %p543_p12 = pnand %p542_p0, %p538_p13 }
  0x85   : > { %546 = shalt.err (!%p543_p12)
}
  0x86   : > { %391 = dma.vmem_to_hbm [thread:$0]  (%p679_p9), %s265_s28, 128, %s262_s8, %s250_s15  }
  0x87 PF: > { %s276_s26 = sand.u32 1, %s585_s9   ;;  %p803_p2 = scmp.ge.s32.totalorder %s605_s14, 2 }
  0x88   : > { %s277_s27 = scalar_lea.sflag [#allocation4], %s276_s26 }
  0x89   : > { %p401_p5 = pnand %p803_p2, %p686_p11 }
  0x8b   : > { %p402_p6 = pneg %p401_p5 }
  0x8d   : > { %580 = dma.done.wait (%p402_p6), %s277_s27, 128  }
  0x8e   : > { %582 = vsyncadd (%p402_p6), %s277_s27, 4294967168  ;;  %s21_s14 = sadd.s32 1, %s605_s14   ;;  %s804_s9 = smov %s589_s10 }
  0x8f   : > { %p18_p4 = scmp.ge.s32.totalorder %s21_s14, 4   ;;  %s805_s10 = smov %s593_s11 }
  0x90   : > { %s806_s11 = smov %s684_s23  ;;  %s807_s12 = smov %s601_s13 }
  0x91   : > { %s808_s13 = smov %s810_s17  ;;  %20 = sbr.rel (!%p18_p4) target bundleno = 8 (0x8), region = 86 }
  0x96   :  { %282 = vsyncpa [#allocation3], 1 }
  0x97   :  { %284 = vsyncpa [#allocation3 + $0x1], 1 }
  0x98   :  { %285 = vsyncpa [#allocation6], 1 }
  0x99   :  { %287 = vsyncpa [#allocation6 + $0x1], 1 }
  0x9a   :  { %288 = vsyncpa [#allocation4], 1 }
  0x9b   :  { %290 = vsyncpa [#allocation4 + $0x1], 1 }

</bundles_post_ra>
